<compile_context>
chip_gen: v6e
topology: v6e:2x2x1
jax: 0.10.0
libtpu: 0.0.40
codegen_flags: <defaults>
</compile_context>

<pallas_src>
import functools
import numpy as np
import jax
import jax.numpy as jnp
from jax.experimental import pallas as pl
from jax.experimental.pallas import tpu as pltpu


# ---------------------------------------------------------------------------
# helpers
# ---------------------------------------------------------------------------
def _round_up(x, m):
    return ((x + m - 1) // m) * m


def _largest_divisor_leq(n, limit):
    limit = max(1, min(n, int(limit)))
    for d in range(limit, 0, -1):
        if n % d == 0:
            return d
    return 1


def _pick_row_tile(n, limit):
    """Largest divisor d of n with d % 8 == 0 or d == n, d <= limit.  Never
    exceeds `limit` (so we never overshoot the VMEM budget)."""
    limit = max(1, min(n, int(limit)))
    for d in range(limit, 0, -1):
        if n % d == 0 and (d % 8 == 0 or d == n):
            return d
    return _largest_divisor_leq(n, limit)


@functools.lru_cache(maxsize=None)
def _vmem_limit_bytes():
    """Scoped-VMEM request: 3/4 of physical capacity, capped at 96 MiB.
    (v5e/v6e -> 96 MiB, v7x (64 MiB/core) -> 48 MiB.)"""
    cap = 128 * 1024 * 1024
    try:
        cap = int(getattr(pltpu.get_tpu_info(), "vmem_capacity_bytes", cap))
    except Exception:
        pass
    return int(min(cap * 3 // 4, 96 * 1024 * 1024))


@functools.lru_cache(maxsize=None)
def _roll_mode():
    """Probe pltpu.roll's convention once ("numpy": out[i]=x[i-shift],
    "reverse": out[i]=x[i+shift], "none": unusable -> concat fallback)."""
    def probe(x_ref, o_ref):
        o_ref[...] = pltpu.roll(x_ref[...], 1, 0)
    try:
        x = jnp.broadcast_to(jnp.arange(8, dtype=jnp.float32)[:, None], (8, 128))
        y = np.asarray(jax.block_until_ready(pl.pallas_call(
            probe, out_shape=jax.ShapeDtypeStruct((8, 128), jnp.float32))(x)))
    except Exception:
        return "none"
    if y[0, 0] == 1.0:
        return "reverse"
    if y[0, 0] == 7.0:
        return "numpy"
    return "none"


# ---------------------------------------------------------------------------
# Conv path: pad(0,1,0,1) + 3x3 stride-2 conv, fused im2col inside the kernel
# ---------------------------------------------------------------------------
def _conv3x3_s2_kernel(a_ref, h_ref, wa_ref, wb_ref, b_ref, o_ref, acc_ref,
                       *, roll_mode):
    # a_ref  : (1, t_ho, 2, wp2, 2*Cin)  band of row-pairs / column super-pixels
    # h_ref  : (1, 1, 1,  wp2, 2*Cin)    halo: top sub-row of the next row-pair
    # wa_ref : (3, 2*Cin, tn)            kw=0/1 weights fused along K, per kh
    # wb_ref : (3, Cin, tn)              kw=2 weights, per kh
    # b_ref  : (1, tn)                   bias (f32, lane padded)
    # o_ref  : (1, t_ho, Wo, tn)         NHWC output band
    # acc_ref: (t_ho*wp2, tn) f32        VMEM accumulator
    t_ho = a_ref.shape[1]
    wp2 = a_ref.shape[3]
    c2 = a_ref.shape[4]
    cin = wb_ref.shape[1]
    wo = o_ref.shape[2]
    tn = o_ref.shape[3]
    mf = t_ho * wp2
    mi = mf - wp2

    def mm(x, w):
        return jnp.dot(x, w, preferred_element_type=jnp.float32)

    def shift_up(x):
        # out[i] = x[i + 1]; the wrap row only ever feeds discarded columns.
        n = x.shape[0]
        if roll_mode == "numpy":
            return pltpu.roll(x, n - 1, 0)
        if roll_mode == "reverse":
            return pltpu.roll(x, 1, 0)
        return jnp.concatenate([x[1:], x[:1]], axis=0)  # safe fallback

    # Free flattens: wp2 % 8 == 0, so collapsing (t_ho, wp2) keeps the tiling.
    x_top = a_ref[0, :, 0, :, :].reshape(mf, c2)    # image rows 2r      (kh = 0)
    x_mid = a_ref[0, :, 1, :, :].reshape(mf, c2)    # image rows 2r + 1  (kh = 1)
    halo = h_ref[0, 0, 0, :, :]                     # image row 2*(band end)

    top_s = shift_up(x_top)                         # next super-pixel (kw = 2)
    mid_s = shift_up(x_mid)
    halo_s = shift_up(halo)

    # kh = 0, 1: full-band dots (kw=0/1 fused along K; kw=2 from the shifted
    # copy, lane slice at offset 0 -> no cross-lane movement).
    acc_ref[...] = mm(x_top, wa_ref[0])
    acc_ref[...] += mm(top_s[:, :cin], wb_ref[0])
    acc_ref[...] += mm(x_mid, wa_ref[1])
    acc_ref[...] += mm(mid_s[:, :cin], wb_ref[1])

    # kh = 2: rows 2r + 2 == next row-pair's top row.  Interior output rows
    # reuse x_top/top_s shifted by one row-pair (offsets/sizes multiples of 8);
    # the band's last output row reads the halo.
    if t_ho > 1:
        acc_ref[pl.ds(0, mi), :] += mm(x_top[wp2:, :], wa_ref[2])
        acc_ref[pl.ds(0, mi), :] += mm(top_s[wp2:, :cin], wb_ref[2])
    acc_ref[pl.ds(mi, wp2), :] += mm(halo, wa_ref[2])
    acc_ref[pl.ds(mi, wp2), :] += mm(halo_s[:, :cin], wb_ref[2])

    out = acc_ref[...] + b_ref[...]
    out = out.reshape(t_ho, wp2, tn)[:, :wo, :]     # drop padded columns once
    o_ref[0] = out.astype(o_ref.dtype)


def conv3x3_stride2_downsample(x, w, b):
    """Equivalent of F.pad(x, (0,1,0,1)) + Conv2d(k=3, stride=2, pad=0). NCHW."""
    B, C, H, W = x.shape
    Cout = w.shape[0]
    Ho = (H - 2) // 2 + 1
    Wo = (W - 2) // 2 + 1
    wp2 = _round_up(Wo + 1, 8)      # super-pixels (col pairs); %8 keeps flattens free
    Wp = 2 * wp2
    Hp = 2 * (Ho + 1)               # Ho+1 row pairs (last pair starts at the pad row)

    dt = x.dtype
    db = jnp.dtype(dt).itemsize

    # NCHW -> NHWC + zero pad (covers F.pad(x, (0,1,0,1)); padding past that is
    # never read).  TODO(synk): an NHWC module boundary would remove these two
    # wrapper-side HBM passes (and the final transpose).
    xh = jnp.transpose(x, (0, 2, 3, 1))
    xh = jnp.pad(xh, ((0, 0), (0, Hp - H), (0, Wp - W), (0, 0)))
    xr = xh.reshape(B, Ho + 1, 2, wp2, 2 * C)       # free reshape

    # Weights OIHW -> (kh, kw, Cin, Cout); fuse kw=0/1 along K, keep kw=2 apart.
    # Keep activation dtype (bf16 MXU rate when activations are bf16).
    Cout_p = _round_up(Cout, 128)
    wt = jnp.transpose(w, (2, 3, 1, 0)).astype(dt)              # (3, 3, C, Cout)
    wa = jnp.pad(wt[:, :2].reshape(3, 2 * C, Cout),
                 ((0, 0), (0, 0), (0, Cout_p - Cout)))          # (3, 2C, Cout_p)
    wb = jnp.pad(wt[:, 2], ((0, 0), (0, 0), (0, Cout_p - Cout)))  # (3, C, Cout_p)
    bt = jnp.pad(b.astype(jnp.float32), (0, Cout_p - Cout)).reshape(1, Cout_p)

    # Cout tile: keep the whole thing when small so the weights stay resident
    # across the (innermost) row-band axis.
    if Cout_p <= 512:
        tn = Cout_p
    elif Cout_p % 256 == 0:
        tn = 256
    else:
        tn = 128

    # VMEM budget (x2 = double buffering of pipelined blocks).
    vmem_limit = _vmem_limit_bytes()
    budget = int(vmem_limit * 0.6)

    def fixed_for(t):
        return 2 * (9 * C * t * db) + 2 * (wp2 * 2 * C * db) + 2 * t * 4

    fixed = fixed_for(tn)
    if fixed > budget // 2 and tn > 128:
        tn = 128
        fixed = fixed_for(tn)
    per_tho = 2 * (2 * wp2 * 2 * C * db) + 2 * (Wo * tn * db) + wp2 * tn * 4
    t_ho = _largest_divisor_leq(Ho, max(1, (budget - fixed) // per_tho))

    c2 = 2 * C
    grid = (B, Cout_p // tn, Ho // t_ho)
    kernel = functools.partial(_conv3x3_s2_kernel, roll_mode=_roll_mode())

    out = pl.pallas_call(
        kernel,
        out_shape=jax.ShapeDtypeStruct((B, Ho, Wo, Cout_p), dt),
        grid=grid,
        in_specs=[
            # band of t_ho row-pairs
            pl.BlockSpec((1, t_ho, 2, wp2, c2),
                         lambda bi, ci, mi: (bi, mi, 0, 0, 0)),
            # halo: top sub-row of the first row-pair of the next band
            pl.BlockSpec((1, 1, 1, wp2, c2),
                         lambda bi, ci, mi: (bi, (mi + 1) * t_ho, 0, 0, 0)),
            pl.BlockSpec((3, c2, tn), lambda bi, ci, mi: (0, 0, ci)),
            pl.BlockSpec((3, C, tn), lambda bi, ci, mi: (0, 0, ci)),
            pl.BlockSpec((1, tn), lambda bi, ci, mi: (0, ci)),
        ],
        out_specs=pl.BlockSpec((1, t_ho, Wo, tn),
                               lambda bi, ci, mi: (bi, mi, 0, ci)),
        scratch_shapes=[pltpu.VMEM((t_ho * wp2, tn), jnp.float32)],
        compiler_params=pltpu.CompilerParams(
            dimension_semantics=("parallel", "parallel", "parallel"),
            vmem_limit_bytes=vmem_limit,
        ),
    )(xr, xr, wa, wb, bt)

    # slice off lane padding + back to NCHW (single fused XLA copy)
    return jnp.transpose(out[..., :Cout], (0, 3, 1, 2))


# ---------------------------------------------------------------------------
# Avg-pool path: 2x2 / stride 2
# ---------------------------------------------------------------------------
def _avgpool2x2_kernel(x_ref, p_ref, o_ref):
    # x_ref : (t_m, k*2*Wc)  k row-pair groups per row ([row 2i | row 2i+1] each)
    # p_ref : (k*2*Wc, k*Wo) block-diagonal pooling matrix (2x2 sum + 0.25 folded)
    # o_ref : (t_m, k*Wo)
    o_ref[...] = jnp.dot(x_ref[...], p_ref[...],
                         preferred_element_type=jnp.float32).astype(o_ref.dtype)


def avg_pool2x2(x):
    """F.avg_pool2d(x, 2, stride=2) for NCHW input (odd trailing row/col dropped)."""
    B, C, H, W = x.shape
    Ho, Wo = H // 2, W // 2
    Hc, Wc = 2 * Ho, 2 * Wo
    if Hc != H or Wc != W:               # PyTorch floor semantics
        x = x[:, :, :Hc, :Wc]
    dt = x.dtype
    db = jnp.dtype(dt).itemsize
    M = B * C * Ho

    # Pack k row-pair groups per kernel row so the output last dim (k*Wo) is
    # lane dense (>=128) and the vreg lanes are filled for small W.
    k = 1
    if Wo < 128 and M > 1:
        k0 = -(-128 // Wo)               # ceil(128 / Wo)
        best = None
        for d in range(k0, min(M, 4 * k0) + 1):
            if M % d == 0:
                best = d
                break
        k = best if best is not None else _largest_divisor_leq(M, k0)
    Mg = M // k
    Kd = k * 2 * Wc
    Nd = k * Wo

    x2 = x.reshape(Mg, Kd)               # free reshape (row-major contiguous)

    # Block-diagonal pooling matrix: folds the vertical AND horizontal pair
    # sums (and the 0.25) into the single MXU dot -> no lane slices / VPU adds.
    cols = (np.arange(2 * Wc) % Wc) // 2
    p_small = (cols[:, None] == np.arange(Wo)[None, :]).astype(np.float32) * 0.25
    pool = jnp.asarray(np.kron(np.eye(k, dtype=np.float32), p_small), dtype=dt)

    vmem_limit = _vmem_limit_bytes()
    row_bytes = (Kd + Nd) * db
    t_m = _pick_row_tile(Mg, max(8, (vmem_limit // 8) // max(1, row_bytes)))

    out = pl.pallas_call(
        _avgpool2x2_kernel,
        out_shape=jax.ShapeDtypeStruct((Mg, Nd), dt),
        grid=(Mg // t_m,),
        in_specs=[
            pl.BlockSpec((t_m, Kd), lambda i: (i, 0)),
            pl.BlockSpec((Kd, Nd), lambda i: (0, 0)),
        ],
        out_specs=pl.BlockSpec((t_m, Nd), lambda i: (i, 0)),
        compiler_params=pltpu.CompilerParams(
            dimension_semantics=("parallel",),
            vmem_limit_bytes=vmem_limit,
        ),
    )(x2, pool)
    return out.reshape(B, C, Ho, Wo)


# ---------------------------------------------------------------------------
# Parameter init (replicates default_init == variance_scaling(1, fan_avg, uniform))
# ---------------------------------------------------------------------------
def ddpm_conv3x3_init(key, in_ch, out_ch, dtype=jnp.float32):
    shape = (out_ch, in_ch, 3, 3)          # PyTorch OIHW
    receptive = 9.0
    fan_in = in_ch * receptive
    fan_out = out_ch * receptive
    variance = 1.0 / ((fan_in + fan_out) / 2.0)
    limit = np.sqrt(3.0 * variance)
    w = jax.random.uniform(key, shape, dtype=dtype, minval=-limit, maxval=limit)
    b = jnp.zeros((out_ch,), dtype=dtype)
    return w, b


# ---------------------------------------------------------------------------
# Downsample module (fir=False paths)
# ---------------------------------------------------------------------------
class DownsamplePallas:
    def __init__(self, in_ch=None, out_ch=None, with_conv=False, fir=False,
                 fir_kernel=(1, 3, 3, 1), key=None):
        out_ch = out_ch if out_ch else in_ch
        if fir:
            # TODO(synk): fir=True depends on up_or_down_sampling.* (FIR resample),
            # which is not part of the reference module; only fir=False is implemented.
            raise NotImplementedError("fir=True path not implemented")
        self.fir = fir
        self.fir_kernel = fir_kernel
        self.with_conv = with_conv
        self.out_ch = out_ch
        if with_conv:
            if key is None:
                key = jax.random.PRNGKey(0)
            w, b = ddpm_conv3x3_init(key, in_ch, out_ch)
            self.weight = w                # (Cout, Cin, 3, 3) OIHW, matches PyTorch
            self.bias = b                  # (Cout,)

    def __call__(self, x):
        if self.with_conv:
            return conv3x3_stride2_downsample(x, self.weight, self.bias)
        return avg_pool2x2(x)


# ---------------------------------------------------------------------------
# Pure-JAX references for verification
# ---------------------------------------------------------------------------
def _ref_conv(x, w, b):
    xp = jnp.pad(x, ((0, 0), (0, 0), (0, 1), (0, 1)))
    out = jax.lax.conv_general_dilated(
        xp, w, window_strides=(2, 2), padding="VALID",
        dimension_numbers=("NCHW", "OIHW", "NCHW"))
    return out + b.reshape(1, -1, 1, 1)


def _ref_avgpool(x):
    B, C, H, W = x.shape
    return x.reshape(B, C, H // 2, 2, W // 2, 2).mean(axis=(3, 5))


if __name__ == "__main__":
    key = jax.random.PRNGKey(0)
    kx, kw = jax.random.split(key)
    x = jax.random.normal(kx, (2, 4, 16, 16), dtype=jnp.float32)

    # Branch 1: fir=False, with_conv=True  -> pad (0,1,0,1) + conv3x3 stride 2
    mod_conv = DownsamplePallas(in_ch=4, out_ch=4, with_conv=True, key=kw)
    y_conv = jax.block_until_ready(mod_conv(x))
    assert y_conv.shape == (2, 4, 8, 8), y_conv.shape
    y_conv_ref = _ref_conv(x, mod_conv.weight, mod_conv.bias)
    np.testing.assert_allclose(np.asarray(y_conv), np.asarray(y_conv_ref),
                               rtol=1e-4, atol=1e-4)

    # Branch 2: fir=False, with_conv=False -> avg_pool2d(2, stride=2)
    mod_pool = DownsamplePallas(in_ch=4, with_conv=False)
    y_pool = jax.block_until_ready(mod_pool(x))
    assert y_pool.shape == (2, 4, 8, 8), y_pool.shape
    np.testing.assert_allclose(np.asarray(y_pool), np.asarray(_ref_avgpool(x)),
                               rtol=1e-5, atol=1e-5)

    print("KERNEL_OK")
</pallas_src>

<mosaic_0001>
module attributes {stable_mosaic.version = 11 : i64} {
  func.func @probe(%arg0: memref<8x128xf32, #tpu.memory_space<vmem>>, %arg1: memref<8x128xf32, #tpu.memory_space<vmem>>) attributes {dimension_semantics = [], scalar_prefetch = 0 : i64, scratch_operands = 0 : i64, tpu.core_type = #tpu.core_type<tc>} {
    %c0 = arith.constant 0 : index
    %c0_0 = arith.constant 0 : index
    %0 = vector.load %arg0[%c0, %c0_0] : memref<8x128xf32, #tpu.memory_space<vmem>>, vector<8x128xf32>
    %c1_i32 = arith.constant 1 : i32
    %1 = tpu.dynamic_rotate %0 by %c1_i32 dim 0 : vector<8x128xf32>, i32 -> vector<8x128xf32>
    %c0_1 = arith.constant 0 : index
    %c0_2 = arith.constant 0 : index
    %2 = vector.load %arg1[%c0_1, %c0_2] : memref<8x128xf32, #tpu.memory_space<vmem>>, vector<8x128xf32>
    tpu.vector_store %arg1[%c0_1, %c0_2], %1 {strides = array<i32>} : memref<8x128xf32, #tpu.memory_space<vmem>>, vector<8x128xf32>,
    return
  }
}

module attributes {stable_mosaic.version = 11 : i64} {
  func.func @_conv3x3_s2_kernel(%arg0: i32, %arg1: i32, %arg2: i32, %arg3: memref<1x8x2x16x8xf32, #tpu.memory_space<vmem>>, %arg4: memref<1x1x1x16x8xf32, #tpu.memory_space<vmem>>, %arg5: memref<3x8x128xf32, #tpu.memory_space<vmem>>, %arg6: memref<3x4x128xf32, #tpu.memory_space<vmem>>, %arg7: memref<1x128xf32, #tpu.memory_space<vmem>>, %arg8: memref<1x8x8x128xf32, #tpu.memory_space<vmem>>, %arg9: memref<128x128xf32, #tpu.memory_space<vmem>>) attributes {dimension_semantics = [#tpu.dimension_semantics<parallel>, #tpu.dimension_semantics<parallel>, #tpu.dimension_semantics<parallel>], iteration_bounds = array<i64: 2, 1, 1>, scalar_prefetch = 0 : i64, scratch_operands = 1 : i64, tpu.core_type = #tpu.core_type<tc>, window_params = [{transform_indices = @transform_0, window_bounds = array<i64: 1, 8, 2, 16, 8>}, {transform_indices = @transform_1, window_bounds = array<i64: 1, 1, 1, 16, 8>}, {transform_indices = @transform_2, window_bounds = array<i64: 3, 8, 128>}, {transform_indices = @transform_3, window_bounds = array<i64: 3, 4, 128>}, {transform_indices = @transform_4, window_bounds = array<i64: 1, 128>}, {transform_indices = @transform_5, window_bounds = array<i64: 1, 8, 8, 128>}]} {
    %c0 = arith.constant 0 : index
    %c0_0 = arith.constant 0 : index
    %c0_1 = arith.constant 0 : index
    %c0_2 = arith.constant 0 : index
    %c0_3 = arith.constant 0 : index
    %0 = vector.load %arg3[%c0, %c0_0, %c0_1, %c0_2, %c0_3] : memref<1x8x2x16x8xf32, #tpu.memory_space<vmem>>, vector<1x8x1x16x8xf32>
    %1 = vector.shape_cast %0 : vector<1x8x1x16x8xf32> to vector<8x16x8xf32>
    %2 = vector.shape_cast %1 : vector<8x16x8xf32> to vector<128x8xf32>
    %c0_4 = arith.constant 0 : index
    %c0_5 = arith.constant 0 : index
    %c1 = arith.constant 1 : index
    %c0_6 = arith.constant 0 : index
    %c0_7 = arith.constant 0 : index
    %3 = vector.load %arg3[%c0_4, %c0_5, %c1, %c0_6, %c0_7] : memref<1x8x2x16x8xf32, #tpu.memory_space<vmem>>, vector<1x8x1x16x8xf32>
    %4 = vector.shape_cast %3 : vector<1x8x1x16x8xf32> to vector<8x16x8xf32>
    %5 = vector.shape_cast %4 : vector<8x16x8xf32> to vector<128x8xf32>
    %c0_8 = arith.constant 0 : index
    %c0_9 = arith.constant 0 : index
    %c0_10 = arith.constant 0 : index
    %c0_11 = arith.constant 0 : index
    %c0_12 = arith.constant 0 : index
    %6 = vector.load %arg4[%c0_8, %c0_9, %c0_10, %c0_11, %c0_12] : memref<1x1x1x16x8xf32, #tpu.memory_space<vmem>>, vector<1x1x1x16x8xf32>
    %7 = vector.shape_cast %6 : vector<1x1x1x16x8xf32> to vector<16x8xf32>
    %8 = vector.extract_strided_slice %2 {offsets = [1, 0], sizes = [127, 8], strides = [1, 1]} : vector<128x8xf32> to vector<127x8xf32>
    %9 = vector.extract_strided_slice %2 {offsets = [0, 0], sizes = [1, 8], strides = [1, 1]} : vector<128x8xf32> to vector<1x8xf32>
    %10 = tpu.concatenate %8, %9 in 0 : vector<127x8xf32>, vector<1x8xf32> -> vector<128x8xf32>
    %11 = vector.extract_strided_slice %5 {offsets = [1, 0], sizes = [127, 8], strides = [1, 1]} : vector<128x8xf32> to vector<127x8xf32>
    %12 = vector.extract_strided_slice %5 {offsets = [0, 0], sizes = [1, 8], strides = [1, 1]} : vector<128x8xf32> to vector<1x8xf32>
    %13 = tpu.concatenate %11, %12 in 0 : vector<127x8xf32>, vector<1x8xf32> -> vector<128x8xf32>
    %14 = vector.extract_strided_slice %7 {offsets = [1, 0], sizes = [15, 8], strides = [1, 1]} : vector<16x8xf32> to vector<15x8xf32>
    %15 = vector.extract_strided_slice %7 {offsets = [0, 0], sizes = [1, 8], strides = [1, 1]} : vector<16x8xf32> to vector<1x8xf32>
    %16 = tpu.concatenate %14, %15 in 0 : vector<15x8xf32>, vector<1x8xf32> -> vector<16x8xf32>
    %c0_13 = arith.constant 0 : index
    %c0_14 = arith.constant 0 : index
    %c0_15 = arith.constant 0 : index
    %17 = vector.load %arg5[%c0_13, %c0_14, %c0_15] : memref<3x8x128xf32, #tpu.memory_space<vmem>>, vector<1x8x128xf32>
    %18 = vector.shape_cast %17 : vector<1x8x128xf32> to vector<8x128xf32>
    %cst = arith.constant dense<0.000000e+00> : vector<128x128xf32>
    %19 = tpu.matmul %2, %18, %cst {dimension_numbers = #tpu.dot_dimension_numbers<[1], [0], [0], [1], [0, 0, 1, 1], [], []>} : vector<128x8xf32>, vector<8x128xf32>, vector<128x128xf32> -> vector<128x128xf32>
    %c0_16 = arith.constant 0 : index
    %c0_17 = arith.constant 0 : index
    %20 = vector.load %arg9[%c0_16, %c0_17] : memref<128x128xf32, #tpu.memory_space<vmem>>, vector<128x128xf32>
    tpu.vector_store %arg9[%c0_16, %c0_17], %19 {strides = array<i32>} : memref<128x128xf32, #tpu.memory_space<vmem>>, vector<128x128xf32>,
    %c0_18 = arith.constant 0 : index
    %c0_19 = arith.constant 0 : index
    %21 = vector.load %arg9[%c0_18, %c0_19] : memref<128x128xf32, #tpu.memory_space<vmem>>, vector<128x128xf32>
    %22 = vector.extract_strided_slice %10 {offsets = [0, 0], sizes = [128, 4], strides = [1, 1]} : vector<128x8xf32> to vector<128x4xf32>
    %c0_20 = arith.constant 0 : index
    %c0_21 = arith.constant 0 : index
    %c0_22 = arith.constant 0 : index
    %23 = vector.load %arg6[%c0_20, %c0_21, %c0_22] : memref<3x4x128xf32, #tpu.memory_space<vmem>>, vector<1x4x128xf32>
    %24 = vector.shape_cast %23 : vector<1x4x128xf32> to vector<4x128xf32>
    %cst_23 = arith.constant dense<0.000000e+00> : vector<128x128xf32>
    %25 = tpu.matmul %22, %24, %cst_23 {dimension_numbers = #tpu.dot_dimension_numbers<[1], [0], [0], [1], [0, 0, 1, 1], [], []>} : vector<128x4xf32>, vector<4x128xf32>, vector<128x128xf32> -> vector<128x128xf32>
    %26 = arith.addf %21, %25 : vector<128x128xf32>
    %c0_24 = arith.constant 0 : index
    %c0_25 = arith.constant 0 : index
    %27 = vector.load %arg9[%c0_24, %c0_25] : memref<128x128xf32, #tpu.memory_space<vmem>>, vector<128x128xf32>
    tpu.vector_store %arg9[%c0_24, %c0_25], %26 {strides = array<i32>} : memref<128x128xf32, #tpu.memory_space<vmem>>, vector<128x128xf32>,
    %c0_26 = arith.constant 0 : index
    %c0_27 = arith.constant 0 : index
    %28 = vector.load %arg9[%c0_26, %c0_27] : memref<128x128xf32, #tpu.memory_space<vmem>>, vector<128x128xf32>
    %c1_28 = arith.constant 1 : index
    %c0_29 = arith.constant 0 : index
    %c0_30 = arith.constant 0 : index
    %29 = vector.load %arg5[%c1_28, %c0_29, %c0_30] : memref<3x8x128xf32, #tpu.memory_space<vmem>>, vector<1x8x128xf32>
    %30 = vector.shape_cast %29 : vector<1x8x128xf32> to vector<8x128xf32>
    %cst_31 = arith.constant dense<0.000000e+00> : vector<128x128xf32>
    %31 = tpu.matmul %5, %30, %cst_31 {dimension_numbers = #tpu.dot_dimension_numbers<[1], [0], [0], [1], [0, 0, 1, 1], [], []>} : vector<128x8xf32>, vector<8x128xf32>, vector<128x128xf32> -> vector<128x128xf32>
    %32 = arith.addf %28, %31 : vector<128x128xf32>
    %c0_32 = arith.constant 0 : index
    %c0_33 = arith.constant 0 : index
    %33 = vector.load %arg9[%c0_32, %c0_33] : memref<128x128xf32, #tpu.memory_space<vmem>>, vector<128x128xf32>
    tpu.vector_store %arg9[%c0_32, %c0_33], %32 {strides = array<i32>} : memref<128x128xf32, #tpu.memory_space<vmem>>, vector<128x128xf32>,
    %c0_34 = arith.constant 0 : index
    %c0_35 = arith.constant 0 : index
    %34 = vector.load %arg9[%c0_34, %c0_35] : memref<128x128xf32, #tpu.memory_space<vmem>>, vector<128x128xf32>
    %35 = vector.extract_strided_slice %13 {offsets = [0, 0], sizes = [128, 4], strides = [1, 1]} : vector<128x8xf32> to vector<128x4xf32>
    %c1_36 = arith.constant 1 : index
    %c0_37 = arith.constant 0 : index
    %c0_38 = arith.constant 0 : index
    %36 = vector.load %arg6[%c1_36, %c0_37, %c0_38] : memref<3x4x128xf32, #tpu.memory_space<vmem>>, vector<1x4x128xf32>
    %37 = vector.shape_cast %36 : vector<1x4x128xf32> to vector<4x128xf32>
    %cst_39 = arith.constant dense<0.000000e+00> : vector<128x128xf32>
    %38 = tpu.matmul %35, %37, %cst_39 {dimension_numbers = #tpu.dot_dimension_numbers<[1], [0], [0], [1], [0, 0, 1, 1], [], []>} : vector<128x4xf32>, vector<4x128xf32>, vector<128x128xf32> -> vector<128x128xf32>
    %39 = arith.addf %34, %38 : vector<128x128xf32>
    %c0_40 = arith.constant 0 : index
    %c0_41 = arith.constant 0 : index
    %40 = vector.load %arg9[%c0_40, %c0_41] : memref<128x128xf32, #tpu.memory_space<vmem>>, vector<128x128xf32>
    tpu.vector_store %arg9[%c0_40, %c0_41], %39 {strides = array<i32>} : memref<128x128xf32, #tpu.memory_space<vmem>>, vector<128x128xf32>,
    %c0_42 = arith.constant 0 : index
    %c0_43 = arith.constant 0 : index
    %41 = vector.load %arg9[%c0_42, %c0_43] : memref<128x128xf32, #tpu.memory_space<vmem>>, vector<112x128xf32>
    %42 = vector.extract_strided_slice %2 {offsets = [16, 0], sizes = [112, 8], strides = [1, 1]} : vector<128x8xf32> to vector<112x8xf32>
    %c2 = arith.constant 2 : index
    %c0_44 = arith.constant 0 : index
    %c0_45 = arith.constant 0 : index
    %43 = vector.load %arg5[%c2, %c0_44, %c0_45] : memref<3x8x128xf32, #tpu.memory_space<vmem>>, vector<1x8x128xf32>
    %44 = vector.shape_cast %43 : vector<1x8x128xf32> to vector<8x128xf32>
    %cst_46 = arith.constant dense<0.000000e+00> : vector<112x128xf32>
    %45 = tpu.matmul %42, %44, %cst_46 {dimension_numbers = #tpu.dot_dimension_numbers<[1], [0], [0], [1], [0, 0, 1, 1], [], []>} : vector<112x8xf32>, vector<8x128xf32>, vector<112x128xf32> -> vector<112x128xf32>
    %46 = arith.addf %41, %45 : vector<112x128xf32>
    %c0_47 = arith.constant 0 : index
    %c0_48 = arith.constant 0 : index
    %47 = vector.load %arg9[%c0_47, %c0_48] : memref<128x128xf32, #tpu.memory_space<vmem>>, vector<112x128xf32>
    tpu.vector_store %arg9[%c0_47, %c0_48], %46 {strides = array<i32>} : memref<128x128xf32, #tpu.memory_space<vmem>>, vector<112x128xf32>,
    %c0_49 = arith.constant 0 : index
    %c0_50 = arith.constant 0 : index
    %48 = vector.load %arg9[%c0_49, %c0_50] : memref<128x128xf32, #tpu.memory_space<vmem>>, vector<112x128xf32>
    %49 = vector.extract_strided_slice %10 {offsets = [16, 0], sizes = [112, 4], strides = [1, 1]} : vector<128x8xf32> to vector<112x4xf32>
    %c2_51 = arith.constant 2 : index
    %c0_52 = arith.constant 0 : index
    %c0_53 = arith.constant 0 : index
    %50 = vector.load %arg6[%c2_51, %c0_52, %c0_53] : memref<3x4x128xf32, #tpu.memory_space<vmem>>, vector<1x4x128xf32>
    %51 = vector.shape_cast %50 : vector<1x4x128xf32> to vector<4x128xf32>
    %cst_54 = arith.constant dense<0.000000e+00> : vector<112x128xf32>
    %52 = tpu.matmul %49, %51, %cst_54 {dimension_numbers = #tpu.dot_dimension_numbers<[1], [0], [0], [1], [0, 0, 1, 1], [], []>} : vector<112x4xf32>, vector<4x128xf32>, vector<112x128xf32> -> vector<112x128xf32>
    %53 = arith.addf %48, %52 : vector<112x128xf32>
    %c0_55 = arith.constant 0 : index
    %c0_56 = arith.constant 0 : index
    %54 = vector.load %arg9[%c0_55, %c0_56] : memref<128x128xf32, #tpu.memory_space<vmem>>, vector<112x128xf32>
    tpu.vector_store %arg9[%c0_55, %c0_56], %53 {strides = array<i32>} : memref<128x128xf32, #tpu.memory_space<vmem>>, vector<112x128xf32>,
    %c112 = arith.constant 112 : index
    %c0_57 = arith.constant 0 : index
    %55 = vector.load %arg9[%c112, %c0_57] : memref<128x128xf32, #tpu.memory_space<vmem>>, vector<16x128xf32>
    %c2_58 = arith.constant 2 : index
    %c0_59 = arith.constant 0 : index
    %c0_60 = arith.constant 0 : index
    %56 = vector.load %arg5[%c2_58, %c0_59, %c0_60] : memref<3x8x128xf32, #tpu.memory_space<vmem>>, vector<1x8x128xf32>
    %57 = vector.shape_cast %56 : vector<1x8x128xf32> to vector<8x128xf32>
    %cst_61 = arith.constant dense<0.000000e+00> : vector<16x128xf32>
    %58 = tpu.matmul %7, %57, %cst_61 {dimension_numbers = #tpu.dot_dimension_numbers<[1], [0], [0], [1], [0, 0, 1, 1], [], []>} : vector<16x8xf32>, vector<8x128xf32>, vector<16x128xf32> -> vector<16x128xf32>
    %59 = arith.addf %55, %58 : vector<16x128xf32>
    %c112_62 = arith.constant 112 : index
    %c0_63 = arith.constant 0 : index
    %60 = vector.load %arg9[%c112_62, %c0_63] : memref<128x128xf32, #tpu.memory_space<vmem>>, vector<16x128xf32>
    tpu.vector_store %arg9[%c112_62, %c0_63], %59 {strides = array<i32>} : memref<128x128xf32, #tpu.memory_space<vmem>>, vector<16x128xf32>,
    %c112_64 = arith.constant 112 : index
    %c0_65 = arith.constant 0 : index
    %61 = vector.load %arg9[%c112_64, %c0_65] : memref<128x128xf32, #tpu.memory_space<vmem>>, vector<16x128xf32>
    %62 = vector.extract_strided_slice %16 {offsets = [0, 0], sizes = [16, 4], strides = [1, 1]} : vector<16x8xf32> to vector<16x4xf32>
    %c2_66 = arith.constant 2 : index
    %c0_67 = arith.constant 0 : index
    %c0_68 = arith.constant 0 : index
    %63 = vector.load %arg6[%c2_66, %c0_67, %c0_68] : memref<3x4x128xf32, #tpu.memory_space<vmem>>, vector<1x4x128xf32>
    %64 = vector.shape_cast %63 : vector<1x4x128xf32> to vector<4x128xf32>
    %cst_69 = arith.constant dense<0.000000e+00> : vector<16x128xf32>
    %65 = tpu.matmul %62, %64, %cst_69 {dimension_numbers = #tpu.dot_dimension_numbers<[1], [0], [0], [1], [0, 0, 1, 1], [], []>} : vector<16x4xf32>, vector<4x128xf32>, vector<16x128xf32> -> vector<16x128xf32>
    %66 = arith.addf %61, %65 : vector<16x128xf32>
    %c112_70 = arith.constant 112 : index
    %c0_71 = arith.constant 0 : index
    %67 = vector.load %arg9[%c112_70, %c0_71] : memref<128x128xf32, #tpu.memory_space<vmem>>, vector<16x128xf32>
    tpu.vector_store %arg9[%c112_70, %c0_71], %66 {strides = array<i32>} : memref<128x128xf32, #tpu.memory_space<vmem>>, vector<16x128xf32>,
    %c0_72 = arith.constant 0 : index
    %c0_73 = arith.constant 0 : index
    %68 = vector.load %arg9[%c0_72, %c0_73] : memref<128x128xf32, #tpu.memory_space<vmem>>, vector<128x128xf32>
    %c0_74 = arith.constant 0 : index
    %c0_75 = arith.constant 0 : index
    %69 = vector.load %arg7[%c0_74, %c0_75] : memref<1x128xf32, #tpu.memory_space<vmem>>, vector<1x128xf32>
    %70 = vector.broadcast %69 : vector<1x128xf32> to vector<128x128xf32>
    %71 = arith.addf %68, %70 : vector<128x128xf32>
    %72 = vector.shape_cast %71 : vector<128x128xf32> to vector<8x16x128xf32>
    %73 = vector.extract_strided_slice %72 {offsets = [0, 0, 0], sizes = [8, 8, 128], strides = [1, 1, 1]} : vector<8x16x128xf32> to vector<8x8x128xf32>
    %c0_76 = arith.constant 0 : index
    %c0_77 = arith.constant 0 : index
    %c0_78 = arith.constant 0 : index
    %c0_79 = arith.constant 0 : index
    %74 = vector.load %arg8[%c0_76, %c0_77, %c0_78, %c0_79] : memref<1x8x8x128xf32, #tpu.memory_space<vmem>>, vector<1x8x8x128xf32>
    %75 = vector.shape_cast %74 : vector<1x8x8x128xf32> to vector<8x8x128xf32>
    %76 = vector.shape_cast %73 : vector<8x8x128xf32> to vector<1x8x8x128xf32>
    tpu.vector_store %arg8[%c0_76, %c0_77, %c0_78, %c0_79], %76 {strides = array<i32>} : memref<1x8x8x128xf32, #tpu.memory_space<vmem>>, vector<1x8x8x128xf32>,
    return
  }
  func.func @transform_0(%arg0: i32, %arg1: i32, %arg2: i32) -> (i32, i32, i32, i32, i32) {
    %c0_i32 = arith.constant 0 : i32
    %c0_i32_0 = arith.constant 0 : i32
    %c0_i32_1 = arith.constant 0 : i32
    %c0_i32_2 = arith.constant 0 : i32
    return %arg0, %arg2, %c0_i32, %c0_i32_0, %c0_i32_1 : i32, i32, i32, i32, i32
  }
  func.func @transform_1(%arg0: i32, %arg1: i32, %arg2: i32) -> (i32, i32, i32, i32, i32) {
    %c1_i32 = arith.constant 1 : i32
    %0 = arith.addi %arg2, %c1_i32 : i32
    %c8_i32 = arith.constant 8 : i32
    %1 = arith.muli %0, %c8_i32 : i32
    %c0_i32 = arith.constant 0 : i32
    %c0_i32_0 = arith.constant 0 : i32
    %c0_i32_1 = arith.constant 0 : i32
    %c0_i32_2 = arith.constant 0 : i32
    return %arg0, %1, %c0_i32, %c0_i32_0, %c0_i32_1 : i32, i32, i32, i32, i32
  }
  func.func @transform_2(%arg0: i32, %arg1: i32, %arg2: i32) -> (i32, i32, i32) {
    %c0_i32 = arith.constant 0 : i32
    %c0_i32_0 = arith.constant 0 : i32
    %c0_i32_1 = arith.constant 0 : i32
    return %c0_i32, %c0_i32_0, %arg1 : i32, i32, i32
  }
  func.func @transform_3(%arg0: i32, %arg1: i32, %arg2: i32) -> (i32, i32, i32) {
    %c0_i32 = arith.constant 0 : i32
    %c0_i32_0 = arith.constant 0 : i32
    %c0_i32_1 = arith.constant 0 : i32
    return %c0_i32, %c0_i32_0, %arg1 : i32, i32, i32
  }
  func.func @transform_4(%arg0: i32, %arg1: i32, %arg2: i32) -> (i32, i32) {
    %c0_i32 = arith.constant 0 : i32
    %c0_i32_0 = arith.constant 0 : i32
    return %c0_i32, %arg1 : i32, i32
  }
  func.func @transform_5(%arg0: i32, %arg1: i32, %arg2: i32) -> (i32, i32, i32, i32) {
    %c0_i32 = arith.constant 0 : i32
    %c0_i32_0 = arith.constant 0 : i32
    return %arg0, %arg2, %c0_i32, %arg1 : i32, i32, i32, i32
  }
}

</mosaic_0001>

<bundles_post_ra>
// kernel: tpu_custom_call.1
= control target key start
LH: loop header
LB: loop body
LE: loop exit
PB: predicated region body
PF: predicated region fallthrough
CT: control target
= control target key end

     0   :  { %6 = vsyncpa [#allocation3], 0  ;;  %s103_s0 = inlined_call_operand.hbm [shape: f32[8,128], index: 0, kind: input, shape index: {}]   ;;  %s104_s1 = inlined_call_operand.hbm [shape: f32[8,128], index: 1, kind: output, shape index: {}]  }
   0x1   :  { %7 = vsyncpa [#allocation4], 0  ;;  %s85_s6 = smov [#allocation2]  }
   0x2   :  { %s14_s7 = sshll.u32 %s85_s6, 4  ;;  %s15_s7 = int_to_ptr.vmem [resolvable:$true] %s14_s7 }
   0x3   :  { %s49_s8 = scalar_lea.vmem %s15_s7, 128  ;;  %p54_p1 = scmp.lt.s32.totalorder %s15_s7, %s15_s7 }
   0x4   :  { %p50_p0 = scmp.ne.s32.totalorder %s15_s7, %s49_s8  ;;  %p55_p2 = scmp.lt.s32.totalorder %s49_s8, %s49_s8 }
   0x6   :  { %p56_p3 = por %p55_p2, %p54_p1 }
   0x8   :  { %p57_p4 = pnand %p56_p3, %p50_p0 }
   0xa   :  { %60 = shalt.err (!%p57_p4)
}
   0xb   :  { %17 = dma.hbm_to_vmem [thread:$0]  %s103_s0, 128, %s15_s7, [#allocation3]  }
   0xc   :  { %81 = dma.done.wait [#allocation3], 128  }
   0xd   :  { %82 = vsyncadd [#allocation3], 4294967168  ;;  %s86_s11 = smov [#allocation5]   ;;  %v21_v0 = vld [vmem:[#allocation2] sm:$0xff] }
   0xe   :  { %s30_s12 = sshll.u32 %s86_s11, 4  ;;  %v22_v1 = vrot.slane %v21_v0, 7  ;;  %s31_s12 = int_to_ptr.vmem [resolvable:$true] %s30_s12 }
   0xf   :  { %s61_s13 = scalar_lea.vmem %s31_s12, 128  ;;  %p66_p6 = scmp.lt.s32.totalorder %s31_s12, %s31_s12 }
  0x10   :  { %23 = vst [vmem:[#allocation5] sm:$0xff] %v22_v1  ;;  %p62_p5 = scmp.ne.s32.totalorder %s31_s12, %s61_s13  ;;  %p67_p7 = scmp.lt.s32.totalorder %s61_s13, %s61_s13 }
  0x12   :  { %p68_p8 = por %p67_p7, %p66_p6 }
  0x14   :  { %p69_p9 = pnand %p68_p8, %p62_p5 }
  0x16   :  { %72 = shalt.err (!%p69_p9)
}
  0x17   :  { %33 = dma.vmem_to_hbm [thread:$0]  %s31_s12, 128, %s104_s1, [#allocation4]  }
  0x18   :  { %83 = dma.done.wait [#allocation4], 128  }
  0x19   :  { %84 = vsyncadd [#allocation4], 4294967168 }
  0x1a   :  { %37 = vsyncpa [#allocation3], 1 }
  0x1b   :  { %38 = vsyncpa [#allocation4], 1 }

// kernel: tpu_custom_call.1
= control target key start
LH: loop header
LB: loop body
LE: loop exit
PB: predicated region body
PF: predicated region fallthrough
CT: control target
= control target key end

     0   :  { %10 = vsyncpa [#allocation4], 0  ;;  %s3295_s0 = inlined_call_operand.vmem [shape: f32[2,9,2,16,8], index: 0, kind: input, shape index: {}]   ;;  %s3296_s1 = inlined_call_operand.vmem [shape: f32[2,9,2,16,8], index: 1, kind: input, shape index: {}]   ;;  %s3297_s2 = inlined_call_operand.vmem [shape: f32[3,8,128], index: 2, kind: input, shape index: {}]   ;;  %s3298_s3 = inlined_call_operand.vmem [shape: f32[3,4,128], index: 3, kind: input, shape index: {}]   ;;  %s3299_s4 = inlined_call_operand.vmem [shape: f32[1,128], index: 4, kind: input, shape index: {}]   ;;  %s3300_s5 = inlined_call_operand.hbm [shape: f32[2,8,8,128], index: 5, kind: output, shape index: {}]  }
   0x1   :  { %12 = vsyncpa [#allocation4 + $0x1], 0  ;;  %s2732_s18 = smov 0   ;;  %s2734_s19 = smov 0  }
   0x2   :  { %s2736_s20 = smov 0   ;;  %s2738_s21 = smov 0  }
   0x3   :  { %s2740_s22 = smov 0   ;;  %s2742_s23 = smov 0  }
   0x4 LB: > { %s2155_s24 = sadd.s32 4294967295, %s2697_s23   ;;  %s2156_s25 = sadd.s32 4294967294, %s2697_s23   ;;  %s2697_s23 = sphi %s2742_s23, %s18_s23   ;;  %s2693_s22 = sphi %s2740_s22, %s3307_s22   ;;  %s2689_s21 = sphi %s2738_s21, %s3306_s21   ;;  %s2685_s20 = sphi %s2736_s20, %s3305_s20   ;;  %s2681_s19 = sphi %s2734_s19, %s3304_s19   ;;  %s2677_s18 = sphi %s2732_s18, %s3303_s18  }
   0x5   : > { %s37_s26 = sadd.s32 1, %s2693_s22  ;;  %s186_s27 = sadd.s32 1, %s2685_s20 }
   0x6   : > { %p39_p0 = scmp.ge.s32.totalorder %s37_s26, 2  ;;  %p196_p1 = scmp.ne.s32.totalorder %s2685_s20, %s2681_s19 }
   0x7   : > { %p197_p2 = scmp.eq.s32.totalorder %s2155_s24, 1  ;;  %p202_p3 = scmp.ne.s32.totalorder %s2681_s19, %s2677_s18 }
   0x8   : > { %s3309_s26 = smov (%p39_p0, %s37_s26), 0  ;;  %p203_p5 = scmp.eq.s32.totalorder %s2156_s25, 1 }
   0x9   : > { %p2772_p4 = por %p197_p2, %p196_p1  ;;  %s179_s29 = ssub.s32 %s2693_s22, %s3309_s26 }
   0xa   : > { %p2162_p6 = scmp.ge.s32.totalorder %s2697_s23, 1  ;;  %p184_p7 = scmp.eq.s32.totalorder %s179_s29, 0 }
   0xb   : > { %p2779_p8 = por %p203_p5, %p202_p3  ;;  %p283_p9 = scmp.lt.s32.totalorder %s2697_s23, 3 }
   0xc   : > { %s2785_s6 = scalar_select %p184_p7, %s2685_s20, %s186_s27  }
   0xd   : > { %p284_p10 = pnand %p2162_p6, %p283_p9 }
   0xe   : > { %p351_p11 = scmp.lt.s32.totalorder (!%p284_p10), %s2689_s21, 1  ;;  %s2296_s27 = sshll.u32 (!%p284_p10), %s2689_s21, 10 }
   0xf   : > { %287 = sbr.rel (%p284_p10) target bundleno = 335 (0x14f), region = 40  ;;  %s2699_s11 = smov (!%p284_p10), [#allocation3]  }
  0x14   : > { %v536_v0 = vld [vmem:[%s3297_s2] sm:$0xff]  ;;  %vm782_vm0 = vcmask 1043456   ;;  %v2215_v2 = vld [vmem:[%s3297_s2 + $0x8] sm:$0xff]  ;;  %s2802_s15 = scalar_select %p351_p11, %s2689_s21, 1  ;;  %vm537_vm1 = vcmask 64512   ;;  %v2817_v4 = vld [vmem:[%s3297_s2 + $0x10] sm:$0xff] }
  0x15   : > { %v747_v1 = vld [vmem:[%s3298_s3] sm:$0xf]  ;;  %2401 = vmatprep.subr.mxu0 %v536_v0  ;;  %v2232_v3 = vld [vmem:[%s3298_s3 + $0x4] sm:$0xf]  ;;  %vm443_vm2 = vcmask 1046528   ;;  %vm748_vm3 = vcmask 31744  }
  0x16   : > { %2427 = vmatprep.subr.msk.mxu1 %vm782_vm0, %v747_v1  ;;  %2402 = vmatpush3.msra.mxu0 %v536_v0  ;;  %s2561_s16 = smul.u32 288, %s2802_s15  ;;  %v2864_v22 = vld [vmem:[%s3298_s3 + $0x8] sm:$0xf]  ;;  %s341_s15 = sand.u32 1, %s2681_s19  }
  0x17   : > { %2428 = vmatpush3.msk.msra.mxu1 %vm782_vm0, %v747_v1  ;;  %2453 = vmatprep.subr.mxu0 %v2215_v2  ;;  %s3250_s10 = scalar_lea.sflag [#allocation4], %s341_s15 }
  0x18   : > { %2479 = vmatprep.subr.msk.mxu1 %vm782_vm0, %v2232_v3  ;;  %s2812_s25 = scalar_lea.vmem %s3295_s0, %s2561_s16  ;;  %s2295_s9 = sadd.s32 256, %s2561_s16 }
  0x19   : > { %v2820_v5 = vld [vmem:[%s2812_s25] sm:$0xff]  ;;  %v393_v6 = vld [vmem:[%s2812_s25 + $0x8] sm:$0xff]  ;;  %s377_s12 = scalar_lea.vmem %s3296_s1, %s2295_s9  ;;  %v2989_v57 = vld [vmem:[%s2812_s25 + $0x10] sm:$0xff]  ;;  %s2163_s16 = sshll.u32 %s341_s15, 6 }
  0x1a   : > { %v2824_v7 = vld [vmem:[%s2812_s25 + $0x20] sm:$0xff]  ;;  %v444_v8 = vrot.slane %v2820_v5, 1  ;;  %2403 = vmatprep.mubr.msk.f32.mxu0 %vm537_vm1, %v2820_v5  ;;  %v445_v9 = vrot.slane %v393_v6, 1  ;;  %v2831_v11 = vld [vmem:[%s2812_s25 + $0x28] sm:$0xff]  ;;  %v2167_v58 = vld [vmem:[%s2812_s25 + $0x18] sm:$0xff]  ;;  %v494_v61 = vrot.slane %v2989_v57, 1  ;;  %s3242_s9 = scalar_lea.hbm %s3300_s5, %s2296_s27 }
  0x1b   : > { %v447_v10 = vrot.slane %v2824_v7, 1  ;;  %v2834_v12 = vld [vmem:[%s2812_s25 + $0x40] sm:$0xff]  ;;  %v2837_v13 = vld [vmem:[%s2812_s25 + $0x48] sm:$0xff]  ;;  %2404 = vmatmul.mubr.msk.f32.vlgmr.msra.gmra.mxu0 %vm537_vm1, %v393_v6  ;;  %v449_v14 = vrot.slane %v2831_v11, 1  ;;  %v495_v62 = vrot.slane %v2167_v58, 1  ;;  %v2168_v63 = vld [vmem:[%s2812_s25 + $0x30] sm:$0xff] }
  0x1c   : > { %v451_v15 = vrot.slane %v2834_v12, 1  ;;  %2454 = vmatpush3.msra.mxu0 %v2215_v2  ;;  %v446_v16 = vsel %vm443_vm2, %v444_v8, %v445_v9  ;;  %2406 = vmatprep.mubr.msk.f32.mxu0 %vm537_vm1, %v2824_v7  ;;  %v453_v18 = vrot.slane %v2837_v13, 1  ;;  %v2850_v19 = vld [vmem:[%s2812_s25 + $0x60] sm:$0xff]  ;;  %v2857_v21 = vld [vmem:[%s2812_s25 + $0x68] sm:$0xff]  ;;  %v2169_v0 = vld [vmem:[%s2812_s25 + $0x38] sm:$0xff]  ;;  %v497_v2 = vrot.slane %v2168_v63, 1 }
  0x1d   : > { %v448_v17 = vsel %vm443_vm2, %v445_v9, %v447_v10  ;;  %2429 = vmatprep.mubr.msk.f32.mxu1 %vm748_vm3, %v446_v16  ;;  %v2854_v20 = vsel %vm443_vm2, %v447_v10, %v449_v14  ;;  %2505 = vmatprep.subr.mxu0 %v2817_v4  ;;  %v455_v24 = vrot.slane %v2850_v19, 1  ;;  %v457_v26 = vrot.slane %v2857_v21, 1  ;;  %v2884_v27 = vld [vmem:[%s2812_s25 + $0x80] sm:$0xff]  ;;  %v2887_v28 = vld [vmem:[%s2812_s25 + $0x88] sm:$0xff]  ;;  %v2170_v6 = vld [vmem:[%s2812_s25 + $0x50] sm:$0xff] }
  0x1e   : > { %2430 = vmatmul.mubr.msk.f32.vlgmr.msra.gmra.mxu1 %vm748_vm3, %v448_v17  ;;  %v2870_v23 = vsel %vm443_vm2, %v449_v14, %v451_v15  ;;  %v2880_v25 = vsel %vm443_vm2, %v451_v15, %v453_v18  ;;  %v459_v30 = vrot.slane %v2884_v27, 1  ;;  %v461_v32 = vrot.slane %v2887_v28, 1  ;;  %v2911_v33 = vld [vmem:[%s2812_s25 + $0xa0] sm:$0xff]  ;;  %v2914_v34 = vld [vmem:[%s2812_s25 + $0xa8] sm:$0xff]  ;;  %v2171_v10 = vld [vmem:[%s2812_s25 + $0x58] sm:$0xff] }
  0x1f   : > { %2480 = vmatpush3.msk.msra.mxu1 %vm782_vm0, %v2232_v3  ;;  %2407 = vmatmul.mubr.msk.f32.gmra.mxu0 %vm537_vm1, %v2831_v11  ;;  %v2901_v29 = vsel %vm443_vm2, %v453_v18, %v455_v24  ;;  %v2907_v31 = vsel %vm443_vm2, %v455_v24, %v457_v26  ;;  %v2916_v35 = vld [vmem:[%s377_s12] sm:$0xff]  ;;  %v463_v37 = vrot.slane %v2911_v33, 1  ;;  %v2928_v38 = vld [vmem:[%s377_s12 + $0x8] sm:$0xff]  ;;  %v465_v40 = vrot.slane %v2914_v34, 1  ;;  %v2172_v15 = vld [vmem:[%s2812_s25 + $0x70] sm:$0xff]  ;;  %s2625_s12 = sshll.u32 %s2699_s11, 4  ;;  %s2626_s12 = int_to_ptr.vmem [resolvable:$false] %s2625_s12 }
  0x20   : > { %2432 = vmatprep.mubr.msk.f32.mxu1 %vm748_vm3, %v2854_v20  ;;  %2409 = vmatprep.mubr.msk.f32.mxu0 %vm537_vm1, %v2834_v12  ;;  %v2925_v36 = vsel %vm443_vm2, %v457_v26, %v459_v30  ;;  %v2933_v39 = vsel %vm443_vm2, %v459_v30, %v461_v32  ;;  %v2937_v41 = vld [vmem:[%s2812_s25 + $0xc0] sm:$0xff]  ;;  %v530_v42 = vrot.slane %v2916_v35, 1  ;;  %v2941_v43 = vld [vmem:[%s2812_s25 + $0xc8] sm:$0xff]  ;;  %v531_v44 = vrot.slane %v2928_v38, 1  ;;  %v2173_v17 = vld [vmem:[%s2812_s25 + $0x78] sm:$0xff]  ;;  %s2627_s13 = scalar_lea.vmem %s2626_s12, 2048 }
  0x21   : > { %2528 = vmatprep.subr.msk.mxu1 %vm782_vm0, %v2864_v22  ;;  %v2951_v45 = vsel %vm443_vm2, %v461_v32, %v463_v37  ;;  %v467_v46 = vrot.slane %v2937_v41, 1  ;;  %v2957_v47 = vsel %vm443_vm2, %v463_v37, %v465_v40  ;;  %v469_v48 = vrot.slane %v2941_v43, 1  ;;  %v2961_v49 = vld [vmem:[%s2812_s25 + $0xe0] sm:$0xff]  ;;  %v2970_v52 = vld [vmem:[%s2812_s25 + $0xe8] sm:$0xff]  ;;  %v2174_v37 = vld [vmem:[%s2812_s25 + $0x90] sm:$0xff] }
  0x22   : > { %2433 = vmatmul.mubr.msk.f32.gmra.mxu1 %vm748_vm3, %v2870_v23  ;;  %v2964_v50 = vsel %vm443_vm2, %v530_v42, %v531_v44  ;;  %v2967_v51 = vsel %vm443_vm2, %v531_v44, %v530_v42  ;;  %v471_v54 = vrot.slane %v2961_v49, 1  ;;  %v473_v56 = vrot.slane %v2970_v52, 1  ;;  %v3042_v18 = vld [vmem:[%s3298_s3 + $0x8] sm:$0xf] }
  0x23   : > { %2410 = vmatmul.mubr.msk.f32.gmra.mxu0 %vm537_vm1, %v2837_v13  ;;  %2435 = vmatprep.mubr.msk.f32.mxu1 %vm748_vm3, %v2880_v25  ;;  %v2979_v53 = vsel %vm443_vm2, %v465_v40, %v467_v46  ;;  %v2985_v55 = vsel %vm443_vm2, %v467_v46, %v469_v48  ;;  %v496_v3 = vsel %vm443_vm2, %v494_v61, %v495_v62  ;;  %v499_v9 = vrot.slane %v2169_v0, 1  ;;  %v2175_v40 = vld [vmem:[%s2812_s25 + $0x98] sm:$0xff] }
  0x24   : > { %2412 = vmatprep.mubr.msk.f32.mxu0 %vm537_vm1, %v2850_v19  ;;  %v2999_v59 = vsel %vm443_vm2, %v469_v48, %v471_v54  ;;  %v3004_v60 = vsel %vm443_vm2, %v471_v54, %v473_v56  ;;  %v3018_v1 = vsel %vm443_vm2, %v473_v56, %v444_v8  ;;  %v498_v5 = vsel %vm443_vm2, %v495_v62, %v497_v2  ;;  %v2176_v48 = vld [vmem:[%s2812_s25 + $0xb0] sm:$0xff]  ;;  %v2177_v54 = vld [vmem:[%s2812_s25 + $0xb8] sm:$0xff] }
  0x25   : > { %v501_v8 = vrot.slane %v2170_v6, 1  ;;  %v503_v14 = vrot.slane %v2171_v10, 1  ;;  %v500_v16 = vsel %vm443_vm2, %v497_v2, %v499_v9  ;;  %v505_v26 = vrot.slane %v2172_v15, 1  ;;  %v2179_v2 = vld [vmem:[%s2812_s25 + $0xd8] sm:$0xff] }
  0x26   : > { %2436 = vmatmul.mubr.msk.f32.gmra.mxu1 %vm748_vm3, %v2901_v29  ;;  %v507_v32 = vrot.slane %v2173_v17, 1  ;;  %v509_v42 = vrot.slane %v2174_v37, 1  ;;  %v511_v46 = vrot.slane %v2175_v40, 1 }
  0x27   : > { %2413 = vmatmul.mubr.msk.f32.gmra.mxu0 %vm537_vm1, %v2857_v21  ;;  %2438 = vmatprep.mubr.msk.f32.mxu1 %vm748_vm3, %v2907_v31  ;;  %v502_v24 = vsel %vm443_vm2, %v499_v9, %v501_v8  ;;  %v504_v30 = vsel %vm443_vm2, %v501_v8, %v503_v14  ;;  %v2181_v8 = vld [vmem:[%s2812_s25 + $0xf8] sm:$0xff] }
  0x28   : > { %2415 = vmatprep.mubr.msk.f32.mxu0 %vm537_vm1, %v2884_v27  ;;  %v508_v44 = vsel %vm443_vm2, %v505_v26, %v507_v32  ;;  %v510_v56 = vsel %vm443_vm2, %v507_v32, %v509_v42  ;;  %v512_v62 = vsel %vm443_vm2, %v509_v42, %v511_v46 }
  0x2a   : > { %2439 = vmatmul.mubr.msk.f32.gmra.mxu1 %vm748_vm3, %v2925_v36 }
  0x2b   : > { %2416 = vmatmul.mubr.msk.f32.gmra.mxu0 %vm537_vm1, %v2887_v28  ;;  %2441 = vmatprep.mubr.msk.f32.mxu1 %vm748_vm3, %v2933_v39 }
  0x2c   : > { %2418 = vmatprep.mubr.msk.f32.mxu0 %vm537_vm1, %v2911_v33 }
  0x2e   : > { %2442 = vmatmul.mubr.msk.f32.gmra.mxu1 %vm748_vm3, %v2951_v45 }
  0x2f   : > { %2419 = vmatmul.mubr.msk.f32.gmra.mxu0 %vm537_vm1, %v2914_v34  ;;  %2444 = vmatprep.mubr.msk.f32.mxu1 %vm748_vm3, %v2957_v47 }
  0x30   : > { %2421 = vmatprep.mubr.msk.f32.mxu0 %vm537_vm1, %v2937_v41 }
  0x32   : > { %2445 = vmatmul.mubr.msk.f32.gmra.mxu1 %vm748_vm3, %v2979_v53 }
  0x33   : > { %2422 = vmatmul.mubr.msk.f32.gmra.mxu0 %vm537_vm1, %v2941_v43  ;;  %2447 = vmatprep.mubr.msk.f32.mxu1 %vm748_vm3, %v2985_v55 }
  0x34   : > { %2424 = vmatprep.mubr.msk.f32.mxu0 %vm537_vm1, %v2961_v49 }
  0x36   : > { %2448 = vmatmul.mubr.msk.f32.gmra.mxu1 %vm748_vm3, %v2999_v59 }
  0x37   : > { %2425 = vmatmul.mubr.msk.f32.gmra.mxu0 %vm537_vm1, %v2970_v52  ;;  %2450 = vmatprep.mubr.msk.f32.mxu1 %vm748_vm3, %v3004_v60 }
  0x38   : > { %2455 = vmatprep.mubr.msk.f32.mxu0 %vm537_vm1, %v2989_v57 }
  0x3a   : > { %2451 = vmatmul.mubr.msk.f32.gmra.mxu1 %vm748_vm3, %v3018_v1 }
  0x3b   : > { %2456 = vmatmul.mubr.msk.f32.vlgmr.msra.gmra.mxu0 %vm537_vm1, %v2167_v58  ;;  %2481 = vmatprep.mubr.msk.f32.mxu1 %vm748_vm3, %v496_v3  ;;  %v513_v58 = vrot.slane %v2176_v48, 1 }
  0x3c   : > { %2506 = vmatpush3.msra.mxu0 %v2817_v4  ;;  %2458 = vmatprep.mubr.msk.f32.mxu0 %vm537_vm1, %v2168_v63  ;;  %v515_v63 = vrot.slane %v2177_v54, 1 }
  0x3d   : > { %2551 = vmatprep.subr.mxu0 %v2817_v4  ;;  %v514_v3 = vsel %vm443_vm2, %v511_v46, %v513_v58 }
  0x3e   : > { %2482 = vmatmul.mubr.msk.f32.vlgmr.msra.gmra.mxu1 %vm748_vm3, %v498_v5  ;;  %v516_v9 = vsel %vm443_vm2, %v513_v58, %v515_v63  ;;  %v2180_v5 = vld [vmem:[%s2812_s25 + $0xf0] sm:$0xff] }
  0x3f   : > { %2529 = vmatpush3.msk.msra.mxu1 %vm782_vm0, %v2864_v22  ;;  %2459 = vmatmul.mubr.msk.f32.gmra.mxu0 %vm537_vm1, %v2169_v0  ;;  %v506_v22 = vsel %vm443_vm2, %v503_v14, %v505_v26  ;;  %v2178_v0 = vld [vmem:[%s2812_s25 + $0xd0] sm:$0xff]  ;;  %s3209_s25 = scalar_lea.vmem [#allocation3], %s2163_s16 }
  0x40   : > { %2484 = vmatprep.mubr.msk.f32.mxu1 %vm748_vm3, %v500_v16  ;;  %2461 = vmatprep.mubr.msk.f32.mxu0 %vm537_vm1, %v2170_v6  ;;  %v517_v6 = vrot.slane %v2178_v0, 1  ;;  %s2006_s29 = sshll.u32 %s3209_s25, 4  ;;  %s3244_s29 = int_to_ptr.vmem [resolvable:$true] %s2006_s29 }
  0x41   : > { %2556 = vmatprep.subr.msk.mxu1 %vm782_vm0, %v3042_v18  ;;  %s2621_s21 = scalar_lea.vmem %s3244_s29, 1024  ;;  %p2628_p1 = scmp.lt.s32.totalorder %s3244_s29, %s2626_s12 }
  0x42   : > { %2485 = vmatmul.mubr.msk.f32.gmra.mxu1 %vm748_vm3, %v502_v24  ;;  %v518_v14 = vsel %vm443_vm2, %v515_v63, %v517_v6  ;;  %p2622_p12 = scmp.ne.s32.totalorder %s3244_s29, %s2621_s21  ;;  %p2629_p2 = scmp.lt.s32.totalorder %s2627_s13, %s2621_s21 }
  0x43   : > { %2462 = vmatmul.mubr.msk.f32.gmra.mxu0 %vm537_vm1, %v2171_v10  ;;  %2487 = vmatprep.mubr.msk.f32.mxu1 %vm748_vm3, %v504_v30  ;;  %v519_v10 = vrot.slane %v2179_v2, 1 }
  0x44   : > { %2464 = vmatprep.mubr.msk.f32.mxu0 %vm537_vm1, %v2172_v15  ;;  %v521_v15 = vrot.slane %v2180_v5, 1  ;;  %p2623_p13 = pnand %p2622_p12, %p2772_p4  ;;  %p2630_p3 = por %p2629_p2, %p2628_p1 }
  0x45   : > { %v520_v16 = vsel %vm443_vm2, %v517_v6, %v519_v10 }
  0x46   : > { %2488 = vmatmul.mubr.msk.f32.gmra.mxu1 %vm748_vm3, %v506_v22  ;;  %v522_v24 = vsel %vm443_vm2, %v519_v10, %v521_v15  ;;  %p2624_p0 = pneg %p2623_p13 }
  0x47   : > { %2465 = vmatmul.mubr.msk.f32.gmra.mxu0 %vm537_vm1, %v2173_v17  ;;  %2490 = vmatprep.mubr.msk.f32.mxu1 %vm748_vm3, %v508_v44  ;;  %v523_v17 = vrot.slane %v2181_v8, 1 }
  0x48   : > { %2467 = vmatprep.mubr.msk.f32.mxu0 %vm537_vm1, %v2174_v37  ;;  %p2631_p5 = pnand %p2630_p3, %p2624_p0 }
  0x49   : > { %v524_v26 = vsel %vm443_vm2, %v521_v15, %v523_v17  ;;  %v527_v30 = vsel %vm443_vm2, %v523_v17, %v494_v61 }
  0x4a   : > { %2491 = vmatmul.mubr.msk.f32.gmra.mxu1 %vm748_vm3, %v510_v56 }
  0x4b   : > { %2468 = vmatmul.mubr.msk.f32.gmra.mxu0 %vm537_vm1, %v2175_v40  ;;  %2493 = vmatprep.mubr.msk.f32.mxu1 %vm748_vm3, %v512_v62 }
  0x4c   : > { %2470 = vmatprep.mubr.msk.f32.mxu0 %vm537_vm1, %v2176_v48 }
  0x4e   : > { %2494 = vmatmul.mubr.msk.f32.gmra.mxu1 %vm748_vm3, %v514_v3 }
  0x4f   : > { %2471 = vmatmul.mubr.msk.f32.gmra.mxu0 %vm537_vm1, %v2177_v54  ;;  %2496 = vmatprep.mubr.msk.f32.mxu1 %vm748_vm3, %v516_v9 }
  0x50   : > { %2473 = vmatprep.mubr.msk.f32.mxu0 %vm537_vm1, %v2178_v0 }
  0x52   : > { %2497 = vmatmul.mubr.msk.f32.gmra.mxu1 %vm748_vm3, %v518_v14 }
  0x53   : > { %2474 = vmatmul.mubr.msk.f32.gmra.mxu0 %vm537_vm1, %v2179_v2  ;;  %2499 = vmatprep.mubr.msk.f32.mxu1 %vm748_vm3, %v520_v16 }
  0x54   : > { %2476 = vmatprep.mubr.msk.f32.mxu0 %vm537_vm1, %v2180_v5 }
  0x56   : > { %2500 = vmatmul.mubr.msk.f32.gmra.mxu1 %vm748_vm3, %v522_v24 }
  0x57   : > { %2477 = vmatmul.mubr.msk.f32.gmra.mxu0 %vm537_vm1, %v2181_v8  ;;  %2502 = vmatprep.mubr.msk.f32.mxu1 %vm748_vm3, %v524_v26 }
  0x58   : > { %2507 = vmatprep.mubr.msk.f32.mxu0 %vm537_vm1, %v2824_v7 }
  0x5a   : > { %2503 = vmatmul.mubr.msk.f32.gmra.mxu1 %vm748_vm3, %v527_v30 }
  0x5b   : > { %2508 = vmatmul.mubr.msk.f32.vlgmr.msra.gmra.mxu0 %vm537_vm1, %v2831_v11  ;;  %2530 = vmatprep.mubr.msk.f32.mxu1 %vm748_vm3, %v2854_v20 }
  0x5c   : > { %2552 = vmatpush3.msra.mxu0 %v2817_v4  ;;  %2510 = vmatprep.mubr.msk.f32.mxu0 %vm537_vm1, %v2834_v12 }
  0x5e   : > { %2531 = vmatmul.mubr.msk.f32.vlgmr.msra.gmra.mxu1 %vm748_vm3, %v2870_v23 }
  0x5f   : > { %2557 = vmatpush3.msk.msra.mxu1 %vm782_vm0, %v3042_v18  ;;  %2511 = vmatmul.mubr.msk.f32.gmra.mxu0 %vm537_vm1, %v2837_v13 }
  0x60   : > { %2533 = vmatprep.mubr.msk.f32.mxu1 %vm748_vm3, %v2880_v25  ;;  %2513 = vmatprep.mubr.msk.f32.mxu0 %vm537_vm1, %v2850_v19 }
  0x62   : > { %2534 = vmatmul.mubr.msk.f32.gmra.mxu1 %vm748_vm3, %v2901_v29 }
  0x63   : > { %2514 = vmatmul.mubr.msk.f32.gmra.mxu0 %vm537_vm1, %v2857_v21  ;;  %2536 = vmatprep.mubr.msk.f32.mxu1 %vm748_vm3, %v2907_v31 }
  0x64   : > { %2516 = vmatprep.mubr.msk.f32.mxu0 %vm537_vm1, %v2884_v27 }
  0x66   : > { %2537 = vmatmul.mubr.msk.f32.gmra.mxu1 %vm748_vm3, %v2925_v36 }
  0x67   : > { %2517 = vmatmul.mubr.msk.f32.gmra.mxu0 %vm537_vm1, %v2887_v28  ;;  %2539 = vmatprep.mubr.msk.f32.mxu1 %vm748_vm3, %v2933_v39 }
  0x68   : > { %2519 = vmatprep.mubr.msk.f32.mxu0 %vm537_vm1, %v2911_v33 }
  0x6a   : > { %2540 = vmatmul.mubr.msk.f32.gmra.mxu1 %vm748_vm3, %v2951_v45 }
  0x6b   : > { %2520 = vmatmul.mubr.msk.f32.gmra.mxu0 %vm537_vm1, %v2914_v34  ;;  %2542 = vmatprep.mubr.msk.f32.mxu1 %vm748_vm3, %v2957_v47 }
  0x6c   : > { %2522 = vmatprep.mubr.msk.f32.mxu0 %vm537_vm1, %v2937_v41 }
  0x6e   : > { %2543 = vmatmul.mubr.msk.f32.gmra.mxu1 %vm748_vm3, %v2979_v53 }
  0x6f   : > { %2523 = vmatmul.mubr.msk.f32.gmra.mxu0 %vm537_vm1, %v2941_v43  ;;  %2545 = vmatprep.mubr.msk.f32.mxu1 %vm748_vm3, %v2985_v55 }
  0x70   : > { %2525 = vmatprep.mubr.msk.f32.mxu0 %vm537_vm1, %v2961_v49 }
  0x72   : > { %2546 = vmatmul.mubr.msk.f32.gmra.mxu1 %vm748_vm3, %v2999_v59 }
  0x73   : > { %2526 = vmatmul.mubr.msk.f32.gmra.mxu0 %vm537_vm1, %v2970_v52  ;;  %2548 = vmatprep.mubr.msk.f32.mxu1 %vm748_vm3, %v3004_v60 }
  0x74   : > { %2553 = vmatprep.mubr.msk.f32.mxu0 %vm537_vm1, %v2916_v35 }
  0x76   : > { %2549 = vmatmul.mubr.msk.f32.gmra.mxu1 %vm748_vm3, %v3018_v1 }
  0x77   : > { %2554 = vmatmul.mubr.msk.f32.vlgmr.msra.gmra.mxu0 %vm537_vm1, %v2928_v38  ;;  %2558 = vmatprep.mubr.msk.f32.mxu1 %vm748_vm3, %v2964_v50 }
  0x7a   : > { %2559 = vmatmul.mubr.msk.f32.vlgmr.msra.gmra.mxu1 %vm748_vm3, %v2967_v51 }
  0xdb   : > { %v2405_v4 = vpop.f32.mrf.mxu0 }
  0xdd   : > { %v636_v7 = vpop.f32.mrf.mxu0 }
  0xde   : > { %v2431_v11 = vpop.f32.mrf.mxu1 }
  0xdf   : > { %v2408_v12 = vpop.f32.mrf.mxu0 }
  0xe0   : > { %v852_v13 = vpop.f32.mrf.mxu1 }
  0xe1   : > { %v646_v19 = vpop.f32.mrf.mxu0  ;;  %v931_v15 = vadd.f32 %v852_v13, %v636_v7 }
  0xe2   : > { %v2434_v20 = vpop.f32.mrf.mxu1 }
  0xe3   : > { %v2411_v21 = vpop.f32.mrf.mxu0 }
  0xe4   : > { %v862_v23 = vpop.f32.mrf.mxu1 }
  0xe5   : > { %v3165_v25 = vpop.f32.mrf.mxu0  ;;  %v933_v4 = vadd.f32 %v862_v23, %v646_v19  ;;  %v3204_v19 = vld [vmem:[%s3299_s4] ss:$0 sm:$0xff] }
  0xe6   : > { %v2437_v27 = vpop.f32.mrf.mxu1 }
  0xe7   : > { %v2414_v28 = vpop.f32.mrf.mxu0 }
  0xe8   : > { %v872_v29 = vpop.f32.mrf.mxu1 }
  0xe9   : > { %v3167_v31 = vpop.f32.mrf.mxu0 }
  0xea   : > { %v2440_v33 = vpop.f32.mrf.mxu1 }
  0xeb   : > { %v2417_v34 = vpop.f32.mrf.mxu0  ;;  %v935_v33 = vadd.f32 %v872_v29, %v3165_v25 }
  0xec   : > { %v3169_v35 = vpop.f32.mrf.mxu1 }
  0xed   : > { %v3171_v36 = vpop.f32.mrf.mxu0 }
  0xee   : > { %v2443_v38 = vpop.f32.mrf.mxu1 }
  0xef   : > { %v2420_v39 = vpop.f32.mrf.mxu0 }
  0xf0   : > { %v3173_v41 = vpop.f32.mrf.mxu1 }
  0xf1   : > { %v3175_v43 = vpop.f32.mrf.mxu0 }
  0xf2   : > { %v2446_v45 = vpop.f32.mrf.mxu1 }
  0xf3   : > { %v2423_v47 = vpop.f32.mrf.mxu0 }
  0xf4   : > { %v3177_v49 = vpop.f32.mrf.mxu1 }
  0xf5   : > { %v3179_v50 = vpop.f32.mrf.mxu0 }
  0xf6   : > { %v2449_v51 = vpop.f32.mrf.mxu1 }
  0xf7   : > { %v2426_v52 = vpop.f32.mrf.mxu0  ;;  %v937_v51 = vadd.f32 %v3169_v35, %v3167_v31 }
  0xf8   : > { %v3181_v53 = vpop.f32.mrf.mxu1 }
  0xf9   : > { %v3183_v55 = vpop.f32.mrf.mxu0 }
  0xfa   : > { %v2452_v57 = vpop.f32.mrf.mxu1 }
  0xfb   : > { %v2457_v59 = vpop.f32.mrf.mxu0 }
  0xfc   : > { %v3185_v60 = vpop.f32.mrf.mxu1 }
  0xfd   : > { %v1079_v61 = vpop.f32.mrf.mxu0 }
  0xfe   : > { %v2483_v1 = vpop.f32.mrf.mxu1  ;;  %v1158_v24 = vadd.f32 %v1079_v61, %v931_v15 }
  0xff   : > { %v2460_v18 = vpop.f32.mrf.mxu0 }
 0x100   : > { %v1310_v32 = vpop.f32.mrf.mxu1 }
 0x101   : > { %v1089_v37 = vpop.f32.mrf.mxu0  ;;  %v1389_v20 = vadd.f32 %v1310_v32, %v1158_v24 }
 0x102   : > { %v2486_v40 = vpop.f32.mrf.mxu1  ;;  %v1160_v21 = vadd.f32 %v1089_v37, %v933_v4  ;;  %v939_v37 = vadd.f32 %v3173_v41, %v3171_v36 }
 0x103   : > { %v2463_v22 = vpop.f32.mrf.mxu0 }
 0x104   : > { %v1320_v42 = vpop.f32.mrf.mxu1 }
 0x105   : > { %v1099_v44 = vpop.f32.mrf.mxu0  ;;  %v1391_v38 = vadd.f32 %v1320_v42, %v1160_v21 }
 0x106   : > { %v2489_v46 = vpop.f32.mrf.mxu1  ;;  %v1162_v39 = vadd.f32 %v1099_v44, %v935_v33 }
 0x107   : > { %v2466_v48 = vpop.f32.mrf.mxu0 }
 0x108   : > { %v1330_v54 = vpop.f32.mrf.mxu1 }
 0x109   : > { %v1109_v56 = vpop.f32.mrf.mxu0  ;;  %v1393_v59 = vadd.f32 %v1330_v54, %v1162_v39 }
 0x10a   : > { %v2492_v58 = vpop.f32.mrf.mxu1  ;;  %v1164_v61 = vadd.f32 %v1109_v56, %v937_v51  ;;  %v941_v56 = vadd.f32 %v3177_v49, %v3175_v43 }
 0x10b   : > { %v2469_v62 = vpop.f32.mrf.mxu0 }
 0x10c   : > { %v1340_v63 = vpop.f32.mrf.mxu1 }
 0x10d   : > { %v1119_v0 = vpop.f32.mrf.mxu0  ;;  %v1395_v42 = vadd.f32 %v1340_v63, %v1164_v61 }
 0x10e   : > { %v2495_v2 = vpop.f32.mrf.mxu1  ;;  %v1166_v44 = vadd.f32 %v1119_v0, %v939_v37  ;;  %v943_v0 = vadd.f32 %v3181_v53, %v3179_v50 }
 0x10f   : > { %v2472_v3 = vpop.f32.mrf.mxu0 }
 0x110   : > { %v1350_v6 = vpop.f32.mrf.mxu1 }
 0x111   : > { %v1129_v9 = vpop.f32.mrf.mxu0  ;;  %v1397_v41 = vadd.f32 %v1350_v6, %v1166_v44 }
 0x112   : > { %v2498_v10 = vpop.f32.mrf.mxu1  ;;  %v1168_v3 = vadd.f32 %v1129_v9, %v941_v56 }
 0x113   : > { %v2475_v5 = vpop.f32.mrf.mxu0 }
 0x114   : > { %v3187_v8 = vpop.f32.mrf.mxu1 }
 0x115   : > { %v3189_v14 = vpop.f32.mrf.mxu0  ;;  %v1399_v49 = vadd.f32 %v3187_v8, %v1168_v3 }
 0x116   : > { %v2501_v16 = vpop.f32.mrf.mxu1  ;;  %v1170_v24 = vadd.f32 %v3189_v14, %v943_v0 }
 0x117   : > { %v2478_v17 = vpop.f32.mrf.mxu0 }
 0x118   : > { %v3191_v26 = vpop.f32.mrf.mxu1 }
 0x119   : > { %v3193_v30 = vpop.f32.mrf.mxu0  ;;  %v1401_v21 = vadd.f32 %v3191_v26, %v1170_v24 }
 0x11a   : > { %v2504_v11 = vpop.f32.mrf.mxu1 }
 0x11b   : > { %v2509_v12 = vpop.f32.mrf.mxu0  ;;  %v945_v11 = vadd.f32 %v3185_v60, %v3183_v55 }
 0x11c   : > { %v3195_v27 = vpop.f32.mrf.mxu1 }
 0x11d   : > { %v1503_v28 = vpop.f32.mrf.mxu0 }
 0x11e   : > { %v1572_v7 = vadd.f32 %v1503_v28, %v1389_v20  ;;  %v2532_v13 = vpop.f32.mrf.mxu1  ;;  %v1172_v28 = vadd.f32 %v3193_v30, %v945_v11 }
 0x11f   : > { %v2512_v34 = vpop.f32.mrf.mxu0 }
 0x120   : > { %v1685_v45 = vpop.f32.mrf.mxu1  ;;  %v1403_v34 = vadd.f32 %v3195_v27, %v1172_v28 }
 0x121   : > { %v1754_v23 = vadd.f32 %v1685_v45, %v1572_v7  ;;  %v1513_v47 = vpop.f32.mrf.mxu0 }
 0x122   : > { %v1574_v52 = vadd.f32 %v1513_v47, %v1391_v38  ;;  %v2535_v25 = vpop.f32.mrf.mxu1 }
 0x123   : > { %v1973_v29 = vadd.f32 %v3204_v19, %v1754_v23  ;;  %v2515_v57 = vpop.f32.mrf.mxu0 }
 0x124   : > { %v1695_v1 = vpop.f32.mrf.mxu1 }
 0x125   : > { %1981 = vst [vmem:[%s3209_s25] sm:$0xff] %v1973_v29  ;;  %v1756_v18 = vadd.f32 %v1695_v1, %v1574_v52  ;;  %v1523_v32 = vpop.f32.mrf.mxu0 }
 0x126   : > { %v1576_v40 = vadd.f32 %v1523_v32, %v1393_v59  ;;  %v2538_v31 = vpop.f32.mrf.mxu1 }
 0x127   : > { %v1974_v35 = vadd.f32 %v3204_v19, %v1756_v18  ;;  %v2518_v22 = vpop.f32.mrf.mxu0 }
 0x128   : > { %v1705_v46 = vpop.f32.mrf.mxu1 }
 0x129   : > { %1982 = vst [vmem:[%s3209_s25 + $0x8] sm:$0xff] %v1974_v35  ;;  %v1758_v48 = vadd.f32 %v1705_v46, %v1576_v40  ;;  %v1533_v54 = vpop.f32.mrf.mxu0 }
 0x12a   : > { %v1578_v58 = vadd.f32 %v1533_v54, %v1395_v42  ;;  %v2541_v62 = vpop.f32.mrf.mxu1 }
 0x12b   : > { %v1975_v2 = vadd.f32 %v3204_v19, %v1758_v48  ;;  %v2521_v36 = vpop.f32.mrf.mxu0 }
 0x12c   : > { %v1715_v10 = vpop.f32.mrf.mxu1 }
 0x12d   : > { %1983 = vst [vmem:[%s3209_s25 + $0x10] sm:$0xff] %v1975_v2  ;;  %v1760_v5 = vadd.f32 %v1715_v10, %v1578_v58  ;;  %v1543_v63 = vpop.f32.mrf.mxu0 }
 0x12e   : > { %v1580_v15 = vadd.f32 %v1543_v63, %v1397_v41  ;;  %v2544_v16 = vpop.f32.mrf.mxu1 }
 0x12f   : > { %v1976_v17 = vadd.f32 %v3204_v19, %v1760_v5  ;;  %v2524_v43 = vpop.f32.mrf.mxu0 }
 0x130   : > { %v1725_v4 = vpop.f32.mrf.mxu1 }
 0x131   : > { %1984 = vst [vmem:[%s3209_s25 + $0x18] sm:$0xff] %v1976_v17  ;;  %v1762_v6 = vadd.f32 %v1725_v4, %v1580_v15  ;;  %v1553_v9 = vpop.f32.mrf.mxu0 }
 0x132   : > { %v1582_v12 = vadd.f32 %v1553_v9, %v1399_v49  ;;  %v2547_v50 = vpop.f32.mrf.mxu1 }
 0x133   : > { %v1977_v53 = vadd.f32 %v3204_v19, %v1762_v6  ;;  %v2527_v20 = vpop.f32.mrf.mxu0 }
 0x134   : > { %v1735_v8 = vpop.f32.mrf.mxu1 }
 0x135   : > { %1985 = vst [vmem:[%s3209_s25 + $0x20] sm:$0xff] %v1977_v53  ;;  %v1764_v14 = vadd.f32 %v1735_v8, %v1582_v12  ;;  %v1563_v33 = vpop.f32.mrf.mxu0 }
 0x136   : > { %v1584_v7 = vadd.f32 %v1563_v33, %v1401_v21  ;;  %v2550_v13 = vpop.f32.mrf.mxu1 }
 0x137   : > { %v1978_v55 = vadd.f32 %v3204_v19, %v1764_v14  ;;  %v2555_v60 = vpop.f32.mrf.mxu0 }
 0x138   : > { %v1745_v38 = vpop.f32.mrf.mxu1 }
 0x139   : > { %1986 = vst [vmem:[%s3209_s25 + $0x28] sm:$0xff] %v1978_v55  ;;  %v1766_v26 = vadd.f32 %v1745_v38, %v1584_v7  ;;  %v1855_v30 = vpop.f32.mrf.mxu0 }
 0x13a   : > { %v1864_v39 = vadd.f32 %v1855_v30, %v1403_v34  ;;  %v2560_v45 = vpop.f32.mrf.mxu1 }
 0x13b   : > { %v1979_v23 = vadd.f32 %v3204_v19, %v1766_v26 }
 0x13c   : > { %v1945_v47 = vpop.f32.mrf.mxu1 }
 0x13d   : > { %1987 = vst [vmem:[%s3209_s25 + $0x30] sm:$0xff] %v1979_v23  ;;  %v1954_v51 = vadd.f32 %v1945_v47, %v1864_v39 }
 0x13f   : > { %v1980_v27 = vadd.f32 %v3204_v19, %v1954_v51 }
 0x141   : > { %1988 = vst [vmem:[%s3209_s25 + $0x38] sm:$0xff] %v1980_v27 }
 0x142   : > { %2634 = shalt.err (!%p2631_p5)
}
 0x143   : > { %s2635_s14 = scalar_lea.hbm %s3242_s9, 1024  ;;  %s2639_s17 = scalar_lea.hbm %s3300_s5, 2048 }
 0x144   : > { %p2636_p6 = scmp.ne.s32.totalorder %s3242_s9, %s2635_s14  ;;  %p2640_p10 = scmp.lt.s32.totalorder %s3242_s9, %s3300_s5 }
 0x145   : > { %p2641_p11 = scmp.lt.s32.totalorder %s2639_s17, %s2635_s14 }
 0x146   : > { %p2637_p7 = pnand %p2636_p6, %p2772_p4 }
 0x147   : > { %p2642_p12 = por %p2641_p11, %p2640_p10 }
 0x148   : > { %p2638_p9 = pneg %p2637_p7 }
 0x14a   : > { %p2643_p13 = pnand %p2642_p12, %p2638_p9 }
 0x14c   : > { %2646 = shalt.err (!%p2643_p13)
}
 0x14d   : > { %s2700_s27 = smov 128   ;;  %s2701_s7 = smov 8  }
 0x14e   : > { %2563 = dma.vmem_to_hbm [thread:$0]  (%p2772_p4), %s3244_s29, 1024, %s3242_s9, %s3250_s10, %s2700_s27, %s2700_s27, %s2701_s7  }
 0x14f PF: > { %p2570_p0 = scmp.ge.s32.totalorder %s2697_s23, 2  ;;  %s2021_s8 = sand.u32 1, %s2677_s18  }
 0x150   : > { %s2022_s21 = scalar_lea.sflag [#allocation4], %s2021_s8 }
 0x151   : > { %p2566_p1 = pnand %p2570_p0, %p2779_p8 }
 0x153   : > { %p2567_p2 = pneg %p2566_p1 }
 0x155   : > { %2672 = dma.done.wait (%p2567_p2), %s2022_s21, 1024  }
 0x156   : > { %2674 = vsyncadd (%p2567_p2), %s2022_s21, 4294966272  ;;  %s18_s23 = sadd.s32 1, %s2697_s23   ;;  %s3303_s18 = smov %s2681_s19 }
 0x157   : > { %p15_p3 = scmp.ge.s32.totalorder %s18_s23, 4   ;;  %s3304_s19 = smov %s2685_s20 }
 0x158   : > { %s3305_s20 = smov %s2785_s6  ;;  %s3306_s21 = smov %s2693_s22 }
 0x159   : > { %s3307_s22 = smov %s3309_s26  ;;  %17 = sbr.rel (!%p15_p3) target bundleno = 4 (0x4), region = 92 }
 0x15e   :  { %2027 = vsyncpa [#allocation4], 1 }
 0x15f   :  { %2029 = vsyncpa [#allocation4 + $0x1], 1 }

</bundles_post_ra>
